<compile_context>
chip_gen: v7x
topology: tpu7x:2x2x1
jax: 0.10.0
libtpu: 0.0.40
codegen_flags: <defaults>
</compile_context>

<pallas_src>
import functools
import inspect

import jax
import jax.numpy as jnp
from jax.experimental import pallas as pl
from jax.experimental.pallas import tpu as pltpu


def _lowrank_kernel(x_ref, a_ref, b_ref, bias_ref, o_ref):
    # x_ref:    (tm, dim)        current row tile (native dtype)
    # a_ref:    (dim, rank_pad)  == lora_A.weight.T, zero-padded along rank
    # b_ref:    (rank_pad, dim)  == lora_B.weight.T, zero-padded along rank
    # bias_ref: (1, dim) f32     lora_B bias (zeros if bias=False)
    x = x_ref[...]
    # MXU consumes native (ideally bf16) operands, accumulates in f32, and
    # pops the low-rank intermediate directly in the weight dtype.
    h = jnp.dot(x, a_ref[...], preferred_element_type=b_ref.dtype)
    p = jnp.dot(h, b_ref[...], preferred_element_type=jnp.float32)
    # Native-dtype epilogue: round (p + bias) once, then add the residual.
    o_ref[...] = (p + bias_ref[...]).astype(o_ref.dtype) + x


def _round_up(n, m):
    return ((n + m - 1) // m) * m


@functools.partial(jax.jit, static_argnames=("tm",))
def low_rank_adversary_forward(x, a_w, b_w, b_bias, *, tm=1024):
    """x: [batch, seq, dim]; a_w: [rank, dim]; b_w: [dim, rank]; b_bias: [dim]."""
    batch, seq, dim = x.shape
    rank = a_w.shape[0]
    M = batch * seq
    dtype = x.dtype
    itemsize = jnp.dtype(dtype).itemsize

    # Sublane alignment: 8 rows for 4-byte, 16 for 2-byte dtypes.
    row_align = max(8, 32 // itemsize)

    # Lane-dense rank padding (multiple of 128 lanes); zero pads are inert.
    rank_pad = _round_up(max(rank, 1), 128)

    # Single-buffer the grid-invariant weights/bias when the API supports it.
    try:
        has_pipeline_mode = ("pipeline_mode"
                             in inspect.signature(pl.BlockSpec).parameters)
    except (TypeError, ValueError):
        has_pipeline_mode = False
    single_buffer_weights = has_pipeline_mode and hasattr(pl, "Buffered")
    resident = ({"pipeline_mode": pl.Buffered(1)}
                if single_buffer_weights else {})
    weight_buf = 1 if single_buffer_weights else 2

    # Generation-aware VMEM budget (v7x: 64 MiB/TC, v5e/v6e: 128 MiB).
    try:
        phys_vmem = int(pltpu.get_tpu_info().vmem_capacity_bytes)
    except Exception:
        phys_vmem = 64 << 20  # conservative (v7x) fallback
    budget = int(phys_vmem * 0.8) - (4 << 20)   # compiler headroom

    # Resident footprint: A^T + B^T in the native dtype, bias in f32.
    weight_bytes = (2 * dim * rank_pad * itemsize + dim * 4) * weight_buf
    # Per-row VMEM cost: double-buffered x/out tiles + the in-kernel f32
    # temporaries (p, h) and the epilogue cast, which all live in VMEM.
    per_row = (4 * dim * itemsize          # x + out, double buffered
               + dim * 4                   # p (f32)
               + rank_pad * 4              # h (<= f32)
               + 2 * dim * itemsize)       # epilogue casts / adds
    avail = max(budget - weight_bytes, 0)
    max_rows = max((avail // per_row) // row_align * row_align, row_align)

    # Guarantee >= 2 grid steps so both v7x TensorCores get work; tm defaults
    # to the 512-1024 row sweet spot (per-step overhead already amortized).
    two_step_cap = max(_round_up(pl.cdiv(M, 2), row_align), row_align)
    tm_eff = max(min(_round_up(tm, row_align), two_step_cap, max_rows),
                 row_align)

    # Non-divisible row grid: the ragged last block's writes are masked.
    num_tiles = pl.cdiv(M, tm_eff)

    x2 = x.reshape(M, dim)
    a_t = a_w.T.astype(dtype)          # (dim, rank)
    b_t = b_w.T.astype(dtype)          # (rank, dim)
    if rank_pad != rank:
        a_t = jnp.pad(a_t, ((0, 0), (0, rank_pad - rank)))
        b_t = jnp.pad(b_t, ((0, rank_pad - rank), (0, 0)))
    bias2 = b_bias.reshape(1, dim).astype(jnp.float32)   # bias added in f32

    in_specs = [
        pl.BlockSpec((tm_eff, dim), lambda i: (i, 0)),                 # x tile
        pl.BlockSpec((dim, rank_pad), lambda i: (0, 0), **resident),   # A^T
        pl.BlockSpec((rank_pad, dim), lambda i: (0, 0), **resident),   # B^T
        pl.BlockSpec((1, dim), lambda i: (0, 0), **resident),          # bias
    ]

    vmem_need = weight_bytes + tm_eff * per_row + (8 << 20)
    vmem_limit = int(min(max(vmem_need, 16 << 20), int(phys_vmem * 0.9)))

    out2 = pl.pallas_call(
        _lowrank_kernel,
        out_shape=jax.ShapeDtypeStruct((M, dim), dtype),
        grid_spec=pltpu.PrefetchScalarGridSpec(
            num_scalar_prefetch=0,
            grid=(num_tiles,),
            in_specs=in_specs,
            out_specs=pl.BlockSpec((tm_eff, dim), lambda i: (i, 0)),
        ),
        compiler_params=pltpu.CompilerParams(
            dimension_semantics=("parallel",),   # v7x: shard rows across 2 TCs
            vmem_limit_bytes=vmem_limit,
        ),
    )(x2, a_t, b_t, bias2)

    return out2.reshape(batch, seq, dim)


def init_params(key, dim, rank, bias=False, zero_init=True, dtype=jnp.float32):
    """Deterministic init mirroring nn.Linear shapes.

    lora_A.weight: (rank, dim); lora_B.weight: (dim, rank); lora_B.bias: (dim,)
    """
    k_a, k_b, k_bias = jax.random.split(key, 3)
    bound_a = 1.0 / jnp.sqrt(dim)
    a_w = jax.random.uniform(k_a, (rank, dim), dtype, -bound_a, bound_a)
    if zero_init:
        b_w = jnp.zeros((dim, rank), dtype)
    else:
        bound_b = 1.0 / jnp.sqrt(rank)
        b_w = jax.random.uniform(k_b, (dim, rank), dtype, -bound_b, bound_b)
    if bias:
        bound_b = 1.0 / jnp.sqrt(rank)
        b_bias = jax.random.uniform(k_bias, (dim,), dtype, -bound_b, bound_b)
    else:
        b_bias = jnp.zeros((dim,), dtype)
    return a_w, b_w, b_bias


def reference_forward(x, a_w, b_w, b_bias):
    h = jnp.einsum("bsd,rd->bsr", x, a_w)
    p = jnp.einsum("bsr,dr->bsd", h, b_w) + b_bias
    return p + x


if __name__ == "__main__":
    key = jax.random.PRNGKey(0)
    k_x, k_p, k_x2 = jax.random.split(key, 3)

    # --- f32, low-rank path active (zero_init=False) with bias ---
    batch, seq, dim, rank = 2, 8, 32, 8
    x = jax.random.normal(k_x, (batch, seq, dim), jnp.float32)
    a_w, b_w, b_bias = init_params(k_p, dim, rank, bias=True, zero_init=False)

    y = jax.block_until_ready(low_rank_adversary_forward(x, a_w, b_w, b_bias))
    y_ref = reference_forward(x, a_w, b_w, b_bias)
    assert y.shape == x.shape and y.dtype == x.dtype
    assert jnp.allclose(y, y_ref, atol=1e-5, rtol=1e-5)

    # --- zero_init=True default: output == x exactly (perturbation is zero) ---
    a_w0, b_w0, b_bias0 = init_params(k_p, dim, rank, bias=False, zero_init=True)
    y0 = jax.block_until_ready(
        low_rank_adversary_forward(x, a_w0, b_w0, b_bias0))
    assert jnp.allclose(y0, x, atol=1e-6)

    # --- ragged M (batch*seq not a multiple of the row tile): masked tail ---
    xr = jax.random.normal(k_x2, (3, 5, dim), jnp.float32)
    yr = jax.block_until_ready(low_rank_adversary_forward(xr, a_w, b_w, b_bias))
    yr_ref = reference_forward(xr, a_w, b_w, b_bias)
    assert jnp.allclose(yr, yr_ref, atol=1e-5, rtol=1e-5)

    # --- bf16 path (native-dtype MXU operands, f32 accumulation) ---
    xb = x.astype(jnp.bfloat16)
    ab = a_w.astype(jnp.bfloat16)
    bb = b_w.astype(jnp.bfloat16)
    biasb = b_bias.astype(jnp.bfloat16)
    yb = jax.block_until_ready(low_rank_adversary_forward(xb, ab, bb, biasb))
    assert yb.dtype == jnp.bfloat16
    assert jnp.allclose(yb.astype(jnp.float32), y_ref, atol=1e-1, rtol=1e-1)

    print("KERNEL_OK")
</pallas_src>

<mosaic_0001>
module attributes {stable_mosaic.version = 11 : i64} {
  func.func @_lowrank_kernel(%arg0: i32, %arg1: memref<8x32xf32, #tpu.memory_space<vmem>>, %arg2: memref<32x128xf32, #tpu.memory_space<vmem>>, %arg3: memref<128x32xf32, #tpu.memory_space<vmem>>, %arg4: memref<1x32xf32, #tpu.memory_space<vmem>>, %arg5: memref<8x32xf32, #tpu.memory_space<vmem>>) attributes {dimension_semantics = [#tpu.dimension_semantics<parallel>], iteration_bounds = array<i64: 2>, scalar_prefetch = 0 : i64, scratch_operands = 0 : i64, tpu.core_type = #tpu.core_type<tc>, window_params = [{transform_indices = @transform_0, window_bounds = array<i64: 8, 32>}, {pipeline_mode = #tpu.pipeline_mode<synchronous>, transform_indices = @transform_1, window_bounds = array<i64: 32, 128>}, {pipeline_mode = #tpu.pipeline_mode<synchronous>, transform_indices = @transform_2, window_bounds = array<i64: 128, 32>}, {pipeline_mode = #tpu.pipeline_mode<synchronous>, transform_indices = @transform_3, window_bounds = array<i64: 1, 32>}, {transform_indices = @transform_4, window_bounds = array<i64: 8, 32>}]} {
    %c0 = arith.constant 0 : index
    %c0_0 = arith.constant 0 : index
    %0 = vector.load %arg1[%c0, %c0_0] : memref<8x32xf32, #tpu.memory_space<vmem>>, vector<8x32xf32>
    %c0_1 = arith.constant 0 : index
    %c0_2 = arith.constant 0 : index
    %1 = vector.load %arg2[%c0_1, %c0_2] : memref<32x128xf32, #tpu.memory_space<vmem>>, vector<32x128xf32>
    %cst = arith.constant dense<0.000000e+00> : vector<8x128xf32>
    %2 = tpu.matmul %0, %1, %cst {dimension_numbers = #tpu.dot_dimension_numbers<[1], [0], [0], [1], [0, 0, 1, 1], [], []>} : vector<8x32xf32>, vector<32x128xf32>, vector<8x128xf32> -> vector<8x128xf32>
    %c0_3 = arith.constant 0 : index
    %c0_4 = arith.constant 0 : index
    %3 = vector.load %arg3[%c0_3, %c0_4] : memref<128x32xf32, #tpu.memory_space<vmem>>, vector<128x32xf32>
    %cst_5 = arith.constant dense<0.000000e+00> : vector<8x32xf32>
    %4 = tpu.matmul %2, %3, %cst_5 {dimension_numbers = #tpu.dot_dimension_numbers<[1], [0], [0], [1], [0, 0, 1, 1], [], []>} : vector<8x128xf32>, vector<128x32xf32>, vector<8x32xf32> -> vector<8x32xf32>
    %c0_6 = arith.constant 0 : index
    %c0_7 = arith.constant 0 : index
    %5 = vector.load %arg4[%c0_6, %c0_7] : memref<1x32xf32, #tpu.memory_space<vmem>>, vector<1x32xf32>
    %6 = vector.broadcast %5 : vector<1x32xf32> to vector<8x32xf32>
    %7 = arith.addf %4, %6 : vector<8x32xf32>
    %8 = arith.addf %7, %0 : vector<8x32xf32>
    %c0_8 = arith.constant 0 : index
    %c0_9 = arith.constant 0 : index
    %9 = vector.load %arg5[%c0_8, %c0_9] : memref<8x32xf32, #tpu.memory_space<vmem>>, vector<8x32xf32>
    tpu.vector_store %arg5[%c0_8, %c0_9], %8 {strides = array<i32>} : memref<8x32xf32, #tpu.memory_space<vmem>>, vector<8x32xf32>,
    return
  }
  func.func @transform_0(%arg0: i32) -> (i32, i32) {
    %c0_i32 = arith.constant 0 : i32
    %c0_i32_0 = arith.constant 0 : i32
    return %arg0, %c0_i32 : i32, i32
  }
  func.func @transform_1(%arg0: i32) -> (i32, i32) {
    %c0_i32 = arith.constant 0 : i32
    %c0_i32_0 = arith.constant 0 : i32
    %c0_i32_1 = arith.constant 0 : i32
    return %c0_i32, %c0_i32_0 : i32, i32
  }
  func.func @transform_2(%arg0: i32) -> (i32, i32) {
    %c0_i32 = arith.constant 0 : i32
    %c0_i32_0 = arith.constant 0 : i32
    %c0_i32_1 = arith.constant 0 : i32
    return %c0_i32, %c0_i32_0 : i32, i32
  }
  func.func @transform_3(%arg0: i32) -> (i32, i32) {
    %c0_i32 = arith.constant 0 : i32
    %c0_i32_0 = arith.constant 0 : i32
    %c0_i32_1 = arith.constant 0 : i32
    return %c0_i32, %c0_i32_0 : i32, i32
  }
  func.func @transform_4(%arg0: i32) -> (i32, i32) {
    %c0_i32 = arith.constant 0 : i32
    %c0_i32_0 = arith.constant 0 : i32
    return %arg0, %c0_i32 : i32, i32
  }
}

</mosaic_0001>

<bundles_post_ra>
// kernel: low_rank_adversary_forward.1
= control target key start
LH: loop header
LB: loop body
LE: loop exit
PB: predicated region body
PF: predicated region fallthrough
CT: control target
= control target key end

     0   :  { %9 = vsyncpa [#allocation3], 0  ;;  %s850_s0 = inlined_call_operand.vmem [shape: f32[16,32], index: 0, kind: input, shape index: {}]   ;;  %s851_s1 = inlined_call_operand.vmem [shape: f32[32,128], index: 1, kind: input, shape index: {}]   ;;  %s852_s2 = inlined_call_operand.vmem [shape: f32[128,32], index: 2, kind: input, shape index: {}]   ;;  %s853_s3 = inlined_call_operand.vmem [shape: f32[1,32], index: 3, kind: input, shape index: {}]   ;;  %s854_s4 = inlined_call_operand.hbm [shape: f32[16,32], index: 4, kind: output, shape index: {}]  }
   0x1   :  { %11 = vsyncpa [#allocation3 + $0x1], 0  ;;  %s685_s15 = smov 0   ;;  %s687_s16 = smov 0  }
   0x2   :  { %s689_s17 = smov 0   ;;  %s691_s18 = smov 0  }
   0x3 LB: > { %s706_s19 = sadd.s32 4294967295, %s654_s18   ;;  %s440_s20 = sadd.s32 4294967294, %s654_s18   ;;  %s654_s18 = sphi %s691_s18, %s860_s18   ;;  %s650_s17 = sphi %s689_s17, %s859_s17   ;;  %s646_s16 = sphi %s687_s16, %s858_s16   ;;  %s642_s15 = sphi %s685_s15, %s857_s15  }
   0x4   : > { %s710_s21 = sadd.s32 1, %s654_s18   ;;  %s113_s22 = sadd.s32 1, %s650_s17 }
   0x5   : > { %s110_s23 = ssub.s32 %s654_s18, %s710_s21  ;;  %p123_p0 = scmp.ne.s32.totalorder %s650_s17, %s646_s16 }
   0x6   : > { %p111_p1 = scmp.eq.s32.totalorder %s110_s23, 0  ;;  %p124_p2 = scmp.eq.s32.totalorder %s706_s19, 1 }
   0x7   : > { %p129_p3 = scmp.ne.s32.totalorder %s646_s16, %s642_s15  ;;  %p130_p4 = scmp.eq.s32.totalorder %s440_s20, 1 }
   0x8   : > { %s721_s24 = scalar_select %p111_p1, %s650_s17, %s113_s22  }
   0x9   : > { %p723_p5 = por %p124_p2, %p123_p0  ;;  %p727_p6 = por %p130_p4, %p129_p3 }
   0xa   : > { %p443_p7 = scmp.ge.s32.totalorder %s654_s18, 1  ;;  %p164_p8 = scmp.lt.s32.totalorder %s654_s18, 3 }
   0xc   : > { %p165_p9 = pnand %p443_p7, %p164_p8 }
   0xd   : > { %v194_v0 = vld [vmem:[%s851_s1] sm:$0xff] (!%p165_p9)  ;;  %v195_v1 = vld [vmem:[%s851_s1 + $0x8] sm:$0xff] (!%p165_p9)  ;;  %v196_v2 = vld [vmem:[%s851_s1 + $0x10] sm:$0xff] (!%p165_p9)  ;;  %v656_v3 = vmov (!%p165_p9), 0.0|0.0   ;;  %vm657_vm0 = vmmov (!%p165_p9), 0   ;;  %v658_v6 = vmov (!%p165_p9), 0.0  }
   0xe   : > { %168 = sbr.rel (%p165_p9) target bundleno = 468 (0x1d4), region = 36  ;;  %520 = vmatprep.subr.bf16.mxu0 (!%p165_p9), %v656_v3  ;;  %v521_v4 = vpack.c.bf16 (!%p165_p9), %v195_v1, %v194_v0  ;;  %v197_v5 = vld [vmem:[%s851_s1 + $0x18] sm:$0xff] (!%p165_p9)  ;;  %482 = vmatprep.mubr.msk.f32.mxu0 (!%p165_p9), %vm657_vm0, %v658_v6  ;;  %p189_p10 = scmp.lt.s32.totalorder (!%p165_p9), %s706_s19, 1  ;;  %v272_v7 = vld [vmem:[%s852_s2] sm:$0xff] (!%p165_p9)  ;;  %v273_v8 = vld [vmem:[%s852_s2 + $0x8] sm:$0xff] (!%p165_p9)  ;;  %vm198_vm1 = vcmask (!%p165_p9), 261120  }
   0xf   : > { %526 = vmatprep.subr.bf16.mxu1 (!%p165_p9), %v656_v3  ;;  %v527_v9 = vpack.c.bf16 (!%p165_p9), %v273_v8, %v272_v7  ;;  %v274_v10 = vld [vmem:[%s852_s2 + $0x10] sm:$0xff] (!%p165_p9)  ;;  %v275_v11 = vld [vmem:[%s852_s2 + $0x18] sm:$0xff] (!%p165_p9)  ;;  %517 = vmatprep.mubr.msk.f32.mxu1 (!%p165_p9), %vm657_vm0, %v658_v6  ;;  %v524_v12 = vpack.c.bf16 (!%p165_p9), %v197_v5, %v196_v2  ;;  %v276_v14 = vld [vmem:[%s852_s2 + $0x20] sm:$0xff] (!%p165_p9)  ;;  %s186_s12 = sand.u32 (!%p165_p9), 1, %s646_s16   ;;  %s449_s22 = sshll.u32 (!%p165_p9), %s706_s19, 7 }
  0x10   : > { %522 = vmatpush3.bf16.msra.mxu0 (!%p165_p9), %v521_v4  ;;  %v530_v13 = vpack.c.bf16 (!%p165_p9), %v275_v11, %v274_v10  ;;  %v277_v15 = vld [vmem:[%s852_s2 + $0x28] sm:$0xff] (!%p165_p9)  ;;  %v278_v18 = vld [vmem:[%s852_s2 + $0x30] sm:$0xff] (!%p165_p9)  ;;  %v279_v19 = vld [vmem:[%s852_s2 + $0x38] sm:$0xff] (!%p165_p9)  ;;  %s444_s13 = sshll.u32 (!%p165_p9), %s186_s12, 3  ;;  %s807_s30 = scalar_lea.hbm (!%p165_p9), %s854_s4, %s449_s22 }
  0x11   : > { %523 = vmatprep.subr.bf16.mxu0 (!%p165_p9), %v656_v3  ;;  %528 = vmatpush3.bf16.msra.mxu1 (!%p165_p9), %v527_v9  ;;  %v533_v17 = vpack.c.bf16 (!%p165_p9), %v277_v15, %v276_v14  ;;  %v536_v20 = vpack.c.bf16 (!%p165_p9), %v279_v19, %v278_v18  ;;  %v280_v21 = vld [vmem:[%s852_s2 + $0x40] sm:$0xff] (!%p165_p9)  ;;  %v281_v22 = vld [vmem:[%s852_s2 + $0x48] sm:$0xff] (!%p165_p9)  ;;  %v282_v24 = vld [vmem:[%s852_s2 + $0x50] sm:$0xff] (!%p165_p9)  ;;  %s368_s5 = scalar_lea.sflag (!%p165_p9), [#allocation3], %s186_s12 }
  0x12   : > { %529 = vmatprep.subr.bf16.mxu1 (!%p165_p9), %v656_v3  ;;  %v539_v23 = vpack.c.bf16 (!%p165_p9), %v281_v22, %v280_v21  ;;  %v283_v25 = vld [vmem:[%s852_s2 + $0x58] sm:$0xff] (!%p165_p9)  ;;  %v284_v27 = vld [vmem:[%s852_s2 + $0x60] sm:$0xff] (!%p165_p9)  ;;  %v285_v28 = vld [vmem:[%s852_s2 + $0x68] sm:$0xff] (!%p165_p9) }
  0x13   : > { %v542_v26 = vpack.c.bf16 (!%p165_p9), %v283_v25, %v282_v24  ;;  %v545_v29 = vpack.c.bf16 (!%p165_p9), %v285_v28, %v284_v27  ;;  %v286_v30 = vld [vmem:[%s852_s2 + $0x70] sm:$0xff] (!%p165_p9)  ;;  %v287_v31 = vld [vmem:[%s852_s2 + $0x78] sm:$0xff] (!%p165_p9)  ;;  %v447_v35 = vld [vmem:[%s853_s3] ss:$0 sm:$0xff] (!%p165_p9) }
  0x14   : > { %525 = vmatpush3.bf16.msra.mxu0 (!%p165_p9), %v524_v12  ;;  %v548_v32 = vpack.c.bf16 (!%p165_p9), %v287_v31, %v286_v30 }
  0x15   : > { %s190_s23 = scalar_select %p189_p10, %s706_s19, 1  ;;  %531 = vmatpush3.bf16.msra.mxu1 %v530_v13 }
  0x16   : > { %532 = vmatprep.subr.bf16.mxu1 %v656_v3  ;;  %s659_s19 = smov [#allocation2]  }
  0x17   : > { %s445_s27 = sshll.u32 %s190_s23, 3  ;;  %s188_s23 = scalar_lea.vmem [#allocation2], %s444_s13 }
  0x18   : > { %s192_s8 = scalar_lea.vmem %s850_s0, %s445_s27  ;;  %s381_s27 = sshll.u32 %s188_s23, 4  ;;  %s809_s27 = int_to_ptr.vmem [resolvable:$true] %s381_s27 }
  0x19   : > { %v193_v16 = vld [vmem:[%s192_s8] sm:$0xff]  ;;  %534 = vmatpush3.bf16.msra.mxu1 %v533_v17  ;;  %s592_s6 = scalar_lea.vmem %s809_s27, 128  ;;  %s596_s7 = sshll.u32 %s659_s19, 4  ;;  %s597_s7 = int_to_ptr.vmem [resolvable:$false] %s596_s7 }
  0x1a   : > { %483 = vmatmul.mubr.msk.f32.vlgmr.msra.gmra.mrb[0].mxu0 %vm198_vm1, %v193_v16  ;;  %535 = vmatprep.subr.bf16.mxu1 %v656_v3  ;;  %p593_p11 = scmp.ne.s32.totalorder %s809_s27, %s592_s6  ;;  %s598_s8 = scalar_lea.vmem %s597_s7, 256 }
  0x1b   : > { %p599_p0 = scmp.lt.s32.totalorder %s809_s27, %s597_s7  ;;  %p600_p1 = scmp.lt.s32.totalorder %s598_s8, %s592_s6 }
  0x1c   : > { %p594_p12 = pnand %p593_p11, %p723_p5 }
  0x1d   : > { %537 = vmatpush3.bf16.msra.mxu1 %v536_v20  ;;  %p601_p2 = por %p600_p1, %p599_p0 }
  0x1e   : > { %538 = vmatprep.subr.bf16.mxu1 %v656_v3  ;;  %p595_p13 = pneg %p594_p12 }
  0x20   : > { %p602_p3 = pnand %p601_p2, %p595_p13 }
  0x21   : > { %540 = vmatpush3.bf16.msra.mxu1 %v539_v23 }
  0x22   : > { %541 = vmatprep.subr.bf16.mxu1 %v656_v3 }
  0x25   : > { %543 = vmatpush3.bf16.msra.mxu1 %v542_v26 }
  0x26   : > { %544 = vmatprep.subr.bf16.mxu1 %v656_v3 }
  0x29   : > { %546 = vmatpush3.bf16.msra.mxu1 %v545_v29 }
  0x2a   : > { %547 = vmatprep.subr.bf16.mxu1 %v656_v3 }
  0x2d   : > { %549 = vmatpush3.bf16.msra.mxu1 %v548_v32 }
  0xed   : > { %v268_v33 = vpop.f32.mrb[0].mxu0 }
  0xee   : > { %v484_v34 = vpop.f32.mrb[1].mxu0  ;;  %518 = vmatmul.mubr.f32.vlgmr.msra.gmra.mrb[0].mxu1 %v268_v33 }
 0x1c1   : > { %v361_v36 = vpop.f32.mrb[0].mxu1 }
 0x1c2   : > { %v362_v37 = vadd.f32 %v447_v35, %v361_v36  ;;  %v519_v38 = vpop.f32.mrb[1].mxu1 }
 0x1c4   : > { %v365_v39 = vadd.f32 %v362_v37, %v193_v16 }
 0x1c6   : > { %366 = vst.msk [vmem:[%s188_s23] sm:$0xff] %vm198_vm1, %v365_v39 }
 0x1c7   : > { %605 = shalt.err (!%p602_p3)
}
 0x1c8   : > { %s606_s9 = scalar_lea.hbm %s807_s30, 128  ;;  %s610_s12 = scalar_lea.hbm %s854_s4, 256 }
 0x1c9   : > { %p607_p4 = scmp.ne.s32.totalorder %s807_s30, %s606_s9  ;;  %p611_p9 = scmp.lt.u32.totalorder %s807_s30, %s854_s4 }
 0x1ca   : > { %p612_p10 = scmp.lt.u32.totalorder %s610_s12, %s606_s9  ;;  %p614_p12 = scmp.lt.u32.totalorder %s606_s9, %s807_s30 }
 0x1cb   : > { %p608_p7 = pnand %p607_p4, %p723_p5 }
 0x1cc   : > { %p613_p11 = por %p612_p10, %p611_p9 }
 0x1cd   : > { %p609_p8 = pneg %p608_p7 }
 0x1ce   : > { %p615_p13 = por %p614_p12, %p613_p11 }
 0x1d0   : > { %p616_p0 = pnand %p615_p13, %p609_p8 }
 0x1d2   : > { %619 = shalt.err (!%p616_p0)
}
 0x1d3   : > { %550 = dma.vmem_to_hbm [thread:$0]  (%p723_p5), %s809_s27, 128, %s807_s30, %s368_s5  }
 0x1d4 PF: > { %p556_p1 = scmp.ge.s32.totalorder %s654_s18, 2  ;;  %s393_s20 = sand.u32 1, %s642_s15  }
 0x1d5   : > { %s394_s22 = scalar_lea.sflag [#allocation3], %s393_s20 }
 0x1d6   : > { %p553_p2 = pnand %p556_p1, %p727_p6 }
 0x1d8   : > { %637 = dma.done.wait (!%p553_p2), %s394_s22, 128  }
 0x1d9   : > { %639 = vsyncadd (!%p553_p2), %s394_s22, 4294967168  ;;  %p14_p3 = scmp.ge.s32.totalorder %s710_s21, 4   ;;  %s857_s15 = smov %s646_s16 }
 0x1da   : > { %s858_s16 = smov %s650_s17  ;;  %s859_s17 = smov %s721_s24 }
 0x1db   : > { %s860_s18 = smov %s710_s21  ;;  %16 = sbr.rel (!%p14_p3) target bundleno = 3 (0x3), region = 71 }
 0x1e2   :  { %399 = vsyncpa [#allocation3], 1 }
 0x1e3   :  { %401 = vsyncpa [#allocation3 + $0x1], 1 }

</bundles_post_ra>
